<compile_context>
chip_gen: v5e
topology: v5e:2x2
jax: 0.10.0
libtpu: 0.0.40
codegen_flags: <defaults>
</compile_context>

<pallas_src>
import functools

import jax
import jax.numpy as jnp
from jax import lax
from jax.experimental import pallas as pl
from jax.experimental.pallas import tpu as pltpu


NEG_INF = -1.0e30


def _round_up(x, m):
    return ((x + m - 1) // m) * m


# ---------------------------------------------------------------------------
# Kernel 1: fused, row-parallel projections (MXU-heavy, pipelined over M tiles)
# ---------------------------------------------------------------------------
def _proj_kernel(att_ref, mod_ref, watt_ref, wmod_ref, bg_ref, bl_ref,
                 xg_ref, lp_ref, *, h8):
    att = att_ref[...]                                                   # (tm, 8H)
    mod = mod_ref[...]                                                   # (tm, 2H)
    # att @ [w_att1 | w_att2]  -> (tm, 2)
    att_out = jnp.dot(att, watt_ref[...], preferred_element_type=jnp.float32)
    # mod @ [W_ih_fwd^T | W_ih_bwd^T | w_mod1 | 0]  -> (tm, 8H + 2)
    mod_out = jnp.dot(mod, wmod_ref[...], preferred_element_type=jnp.float32)
    # BiLSTM input gate pre-activations (+ fused b_ih + b_hh), lane-dense 8H.
    xg_ref[...] = mod_out[:, :h8] + bg_ref[...]
    # col 0 = logits_1 = att@w1 + mod@w_mod1 + (b_att1 + b_mod1)
    # col 1 = att@w2 + (b_att2 + b_mod2)   (mod_2 part added later)
    lp_ref[...] = att_out + mod_out[:, h8:h8 + 2] + bl_ref[...]


# ---------------------------------------------------------------------------
# Kernel 2: bidirectional LSTM recurrence (sequential over time, fwd/bwd fused)
# ---------------------------------------------------------------------------
def _bilstm_kernel(xg_ref, mask_ref, whh_ref, w2_ref, l2_ref, hf_ref, hb_ref,
                   *, seq_len, hidden):
    S, H = seq_len, hidden
    tb = xg_ref.shape[1]
    whh = whh_ref[...]                       # (2H, 8H) block-diag [fwd | bwd], hoisted
    zeros = jnp.zeros((tb, H), jnp.float32)

    def cell(gates, h, c, m):
        # PyTorch LSTM gate order: i, f, g, o
        i = jax.nn.sigmoid(gates[:, 0 * H:1 * H])
        f = jax.nn.sigmoid(gates[:, 1 * H:2 * H])
        g = jnp.tanh(gates[:, 2 * H:3 * H])
        o = jax.nn.sigmoid(gates[:, 3 * H:4 * H])
        c_new = f * c + i * g
        h_new = o * jnp.tanh(c_new)
        # fused masked update: x + m*(x_new - x)   (one mul cheaper than m*a+(1-m)*b)
        return h + m * (h_new - h), c + m * (c_new - c)

    def step(t, carry):
        h_f, c_f, h_b, c_b = carry
        t_b = S - 1 - t
        xg_f = xg_ref[t]                     # (tb, 8H) dynamic first-axis load
        xg_b = xg_ref[t_b]
        m_f = mask_ref[t]                    # (tb, 1)
        m_b = mask_ref[t_b]
        # single recurrent matmul for both directions (block-diagonal weights)
        gh = jnp.dot(jnp.concatenate([h_f, h_b], axis=-1), whh,
                     preferred_element_type=jnp.float32)          # (tb, 8H)
        h_f, c_f = cell(xg_f[:, :4 * H] + gh[:, :4 * H], h_f, c_f, m_f)
        h_b, c_b = cell(xg_b[:, 4 * H:] + gh[:, 4 * H:], h_b, c_b, m_b)
        # packed-sequence semantics: padded positions emit zeros
        hf_ref[t] = m_f * h_f
        hb_ref[t_b] = m_b * h_b
        return h_f, c_f, h_b, c_b

    lax.fori_loop(0, S, step, (zeros, zeros, zeros, zeros))

    # mod_2 contribution to logits_2:  sum_H ( h_fwd * w2[:H] + h_bwd * w2[H:] )
    w2 = w2_ref[...]                                              # (1, 2H)
    w2f = w2[:, :H].reshape(1, 1, H)
    w2b = w2[:, H:].reshape(1, 1, H)
    l2_ref[...] = (jnp.sum(hf_ref[...] * w2f, axis=-1) +
                   jnp.sum(hb_ref[...] * w2b, axis=-1))           # (S, tb)


# ---------------------------------------------------------------------------
# Kernel 3: masked log-softmax for start / end pointers
# ---------------------------------------------------------------------------
def _pointer_kernel(l1_ref, l2a_ref, l2m_ref, mask_ref, p1_ref, p2_ref):
    mask = mask_ref[...]
    inv = 1.0 - mask

    def masked_log_softmax(logits):
        ml = mask * logits + inv * NEG_INF
        m = jnp.max(ml, axis=-1, keepdims=True)
        lse = m + jnp.log(jnp.sum(jnp.exp(ml - m), axis=-1, keepdims=True))
        return ml - lse

    p1_ref[...] = masked_log_softmax(l1_ref[...])
    p2_ref[...] = masked_log_softmax(l2a_ref[...] + l2m_ref[...])


# ---------------------------------------------------------------------------
# Wrapper
# ---------------------------------------------------------------------------
def bidaf_output_forward(att, mod, mask, params):
    """Forward of BiDAFOutput (eval mode).  att:(B,S,8H)  mod:(B,S,2H)  mask:(B,S)."""
    B, S, A = att.shape
    H2 = mod.shape[-1]
    H = H2 // 2
    H8 = 8 * H
    assert A == H8
    f32 = jnp.float32

    att = att.astype(f32)
    mod = mod.astype(f32)
    maskf = mask.astype(f32)

    # ---- weight fusion (wrapper-side layout plumbing, done once) ----
    w_att_fused = jnp.concatenate(
        [params["w_att1"].T, params["w_att2"].T], axis=1)                       # (8H, 2)
    w_mod_fused = jnp.concatenate(
        [params["w_ih_f"].T, params["w_ih_b"].T, params["w_mod1"].T,
         jnp.zeros((H2, 1), f32)], axis=1)                                      # (2H, 8H+2)
    b_gates = jnp.concatenate([params["b_ih_f"] + params["b_hh_f"],
                               params["b_ih_b"] + params["b_hh_b"]])[None, :]   # (1, 8H)
    b_logits = jnp.stack([params["b_att1"] + params["b_mod1"],
                          params["b_att2"] + params["b_mod2"]], axis=1)         # (1, 2)
    w_hh_blk = jnp.zeros((H2, H8), f32)
    w_hh_blk = w_hh_blk.at[:H, :4 * H].set(params["w_hh_f"].T)
    w_hh_blk = w_hh_blk.at[H:, 4 * H:].set(params["w_hh_b"].T)                  # (2H, 8H)

    # ---- kernel 1: row-tiled fused projections ----
    M = B * S
    att2d = att.reshape(M, H8)
    mod2d = mod.reshape(M, H2)
    tm = min(512, _round_up(M, 8))          # 512-row tiles for real sizes, fits v7x VMEM
    Mp = _round_up(M, tm)
    if Mp != M:
        att2d = jnp.pad(att2d, ((0, Mp - M), (0, 0)))
        mod2d = jnp.pad(mod2d, ((0, Mp - M), (0, 0)))

    xg, lp = pl.pallas_call(
        functools.partial(_proj_kernel, h8=H8),
        out_shape=(jax.ShapeDtypeStruct((Mp, H8), f32),
                   jax.ShapeDtypeStruct((Mp, 2), f32)),
        grid=(Mp // tm,),
        in_specs=[
            pl.BlockSpec((tm, H8), lambda i: (i, 0)),        # att rows
            pl.BlockSpec((tm, H2), lambda i: (i, 0)),        # mod rows
            pl.BlockSpec((H8, 2), lambda i: (0, 0)),         # fused att weights
            pl.BlockSpec((H2, H8 + 2), lambda i: (0, 0)),    # fused mod weights
            pl.BlockSpec((1, H8), lambda i: (0, 0)),         # fused LSTM biases
            pl.BlockSpec((1, 2), lambda i: (0, 0)),          # fused logit biases
        ],
        out_specs=(
            pl.BlockSpec((tm, H8), lambda i: (i, 0)),
            pl.BlockSpec((tm, 2), lambda i: (i, 0)),
        ),
        compiler_params=pltpu.CompilerParams(
            dimension_semantics=("parallel",),
            vmem_limit_bytes=32 * 1024 * 1024),
    )(att2d, mod2d, w_att_fused, w_mod_fused, b_gates, b_logits)

    xg = xg[:M]
    lp = lp[:M]
    logits_1 = lp[:, 0].reshape(B, S)
    logits_2_att = lp[:, 1].reshape(B, S)

    # ---- kernel 2: BiLSTM recurrence (time on leading axis for dynamic indexing) ----
    xg_sb = xg.reshape(B, S, H8).transpose(1, 0, 2)          # (S, B, 8H)
    mask_sb = maskf.T.reshape(S, B, 1)                       # (S, B, 1)

    l2m_sb = pl.pallas_call(
        functools.partial(_bilstm_kernel, seq_len=S, hidden=H),
        out_shape=jax.ShapeDtypeStruct((S, B), f32),
        scratch_shapes=[pltpu.VMEM((S, B, H), f32),          # fwd hidden per step
                        pltpu.VMEM((S, B, H), f32)],         # bwd hidden per step
    )(xg_sb, mask_sb, w_hh_blk, params["w_mod2"].astype(f32))
    logits_2_mod = l2m_sb.T                                   # (B, S)

    # ---- kernel 3: masked log-softmax ----
    log_p1, log_p2 = pl.pallas_call(
        _pointer_kernel,
        out_shape=(jax.ShapeDtypeStruct((B, S), f32),
                   jax.ShapeDtypeStruct((B, S), f32)),
    )(logits_1, logits_2_att, logits_2_mod, maskf)

    return log_p1, log_p2


# ---------------------------------------------------------------------------
# Pure-JAX reference (mirrors the PyTorch forward, eval mode)
# ---------------------------------------------------------------------------
def _reference_bidaf_output(att, mod, mask, params):
    B, S, _ = att.shape
    H = mod.shape[-1] // 2
    maskf = mask.astype(jnp.float32)

    def linear(x, w, b):
        return x @ w.T + b

    logits_1 = (linear(att, params["w_att1"], params["b_att1"]) +
                linear(mod, params["w_mod1"], params["b_mod1"]))          # (B,S,1)

    def lstm_dir(wih, whh, bih, bhh, reverse):
        h = jnp.zeros((B, H), jnp.float32)
        c = jnp.zeros((B, H), jnp.float32)
        outs = [None] * S
        order = range(S - 1, -1, -1) if reverse else range(S)
        for t in order:
            g = mod[:, t] @ wih.T + bih + h @ whh.T + bhh
            i = jax.nn.sigmoid(g[:, :H])
            f = jax.nn.sigmoid(g[:, H:2 * H])
            gg = jnp.tanh(g[:, 2 * H:3 * H])
            o = jax.nn.sigmoid(g[:, 3 * H:])
            c_new = f * c + i * gg
            h_new = o * jnp.tanh(c_new)
            m = maskf[:, t:t + 1]
            h = m * h_new + (1.0 - m) * h
            c = m * c_new + (1.0 - m) * c
            outs[t] = m * h                 # packed-sequence: padded steps emit 0
        return jnp.stack(outs, axis=1)      # (B, S, H)

    fwd = lstm_dir(params["w_ih_f"], params["w_hh_f"],
                   params["b_ih_f"], params["b_hh_f"], False)
    bwd = lstm_dir(params["w_ih_b"], params["w_hh_b"],
                   params["b_ih_b"], params["b_hh_b"], True)
    mod_2 = jnp.concatenate([fwd, bwd], axis=-1)                          # (B,S,2H)

    logits_2 = (linear(att, params["w_att2"], params["b_att2"]) +
                linear(mod_2, params["w_mod2"], params["b_mod2"]))

    def masked_log_softmax(lg):
        lg = lg[..., 0]
        ml = maskf * lg + (1.0 - maskf) * NEG_INF
        return jax.nn.log_softmax(ml, axis=-1)

    return masked_log_softmax(logits_1), masked_log_softmax(logits_2)


if __name__ == "__main__":
    H = 32
    B, S = 2, 8

    key = jax.random.PRNGKey(0)
    keys = jax.random.split(key, 20)

    def uni(k, shape, fan_in):
        b = 1.0 / (fan_in ** 0.5)
        return jax.random.uniform(k, shape, minval=-b, maxval=b, dtype=jnp.float32)

    att = jax.random.normal(keys[0], (B, S, 8 * H), dtype=jnp.float32)
    mod = jax.random.normal(keys[1], (B, S, 2 * H), dtype=jnp.float32)
    # right-padded mask (lengths 8 and 5)
    lengths = jnp.array([8, 5])
    mask = (jnp.arange(S)[None, :] < lengths[:, None]).astype(jnp.float32)

    params = {
        # pointer linears, PyTorch nn.Linear orientation (out, in)
        "w_att1": uni(keys[2], (1, 8 * H), 8 * H), "b_att1": uni(keys[3], (1,), 8 * H),
        "w_mod1": uni(keys[4], (1, 2 * H), 2 * H), "b_mod1": uni(keys[5], (1,), 2 * H),
        "w_att2": uni(keys[6], (1, 8 * H), 8 * H), "b_att2": uni(keys[7], (1,), 8 * H),
        "w_mod2": uni(keys[8], (1, 2 * H), 2 * H), "b_mod2": uni(keys[9], (1,), 2 * H),
        # bidirectional LSTM (1 layer), PyTorch nn.LSTM orientation
        "w_ih_f": uni(keys[10], (4 * H, 2 * H), H), "w_hh_f": uni(keys[11], (4 * H, H), H),
        "b_ih_f": uni(keys[12], (4 * H,), H),       "b_hh_f": uni(keys[13], (4 * H,), H),
        "w_ih_b": uni(keys[14], (4 * H, 2 * H), H), "w_hh_b": uni(keys[15], (4 * H, H), H),
        "b_ih_b": uni(keys[16], (4 * H,), H),       "b_hh_b": uni(keys[17], (4 * H,), H),
    }

    fwd_fn = jax.jit(bidaf_output_forward)
    log_p1, log_p2 = fwd_fn(att, mod, mask, params)
    log_p1, log_p2 = jax.block_until_ready((log_p1, log_p2))

    with jax.default_matmul_precision("highest"):
        ref_p1, ref_p2 = _reference_bidaf_output(att, mod, mask, params)

    assert log_p1.shape == (B, S) and log_p2.shape == (B, S)
    # tolerance absorbs MXU vs XLA matmul pass differences; structural bugs are >> this
    assert jnp.allclose(log_p1, ref_p1, atol=2e-3, rtol=2e-3), "log_p1 mismatch"
    assert jnp.allclose(log_p2, ref_p2, atol=2e-3, rtol=2e-3), "log_p2 mismatch"

    print("KERNEL_OK")
</pallas_src>

<mosaic_0001>
module attributes {stable_mosaic.version = 11 : i64} {
  func.func @_proj_kernel(%arg0: i32, %arg1: memref<16x256xf32, #tpu.memory_space<vmem>>, %arg2: memref<16x64xf32, #tpu.memory_space<vmem>>, %arg3: memref<256x2xf32, #tpu.memory_space<vmem>>, %arg4: memref<64x258xf32, #tpu.memory_space<vmem>>, %arg5: memref<1x256xf32, #tpu.memory_space<vmem>>, %arg6: memref<1x2xf32, #tpu.memory_space<vmem>>, %arg7: memref<16x256xf32, #tpu.memory_space<vmem>>, %arg8: memref<16x2xf32, #tpu.memory_space<vmem>>) attributes {dimension_semantics = [#tpu.dimension_semantics<parallel>], iteration_bounds = array<i64: 1>, scalar_prefetch = 0 : i64, scratch_operands = 0 : i64, tpu.core_type = #tpu.core_type<tc>, window_params = [{transform_indices = @transform_0, window_bounds = array<i64: 16, 256>}, {transform_indices = @transform_1, window_bounds = array<i64: 16, 64>}, {pipeline_mode = #tpu.pipeline_mode<synchronous>, transform_indices = @transform_2, window_bounds = array<i64: 256, 2>}, {pipeline_mode = #tpu.pipeline_mode<synchronous>, transform_indices = @transform_3, window_bounds = array<i64: 64, 258>}, {pipeline_mode = #tpu.pipeline_mode<synchronous>, transform_indices = @transform_4, window_bounds = array<i64: 1, 256>}, {pipeline_mode = #tpu.pipeline_mode<synchronous>, transform_indices = @transform_5, window_bounds = array<i64: 1, 2>}, {transform_indices = @transform_6, window_bounds = array<i64: 16, 256>}, {transform_indices = @transform_7, window_bounds = array<i64: 16, 2>}]} {
    %c0 = arith.constant 0 : index
    %c0_0 = arith.constant 0 : index
    %0 = vector.load %arg1[%c0, %c0_0] : memref<16x256xf32, #tpu.memory_space<vmem>>, vector<16x256xf32>
    %c0_1 = arith.constant 0 : index
    %c0_2 = arith.constant 0 : index
    %1 = vector.load %arg2[%c0_1, %c0_2] : memref<16x64xf32, #tpu.memory_space<vmem>>, vector<16x64xf32>
    %c0_3 = arith.constant 0 : index
    %c0_4 = arith.constant 0 : index
    %2 = vector.load %arg3[%c0_3, %c0_4] : memref<256x2xf32, #tpu.memory_space<vmem>>, vector<256x2xf32>
    %cst = arith.constant dense<0.000000e+00> : vector<16x2xf32>
    %3 = tpu.matmul %0, %2, %cst {dimension_numbers = #tpu.dot_dimension_numbers<[1], [0], [0], [1], [0, 0, 1, 1], [], []>} : vector<16x256xf32>, vector<256x2xf32>, vector<16x2xf32> -> vector<16x2xf32>
    %c0_5 = arith.constant 0 : index
    %c0_6 = arith.constant 0 : index
    %4 = vector.load %arg4[%c0_5, %c0_6] : memref<64x258xf32, #tpu.memory_space<vmem>>, vector<64x258xf32>
    %cst_7 = arith.constant dense<0.000000e+00> : vector<16x258xf32>
    %5 = tpu.matmul %1, %4, %cst_7 {dimension_numbers = #tpu.dot_dimension_numbers<[1], [0], [0], [1], [0, 0, 1, 1], [], []>} : vector<16x64xf32>, vector<64x258xf32>, vector<16x258xf32> -> vector<16x258xf32>
    %6 = vector.extract_strided_slice %5 {offsets = [0, 0], sizes = [16, 256], strides = [1, 1]} : vector<16x258xf32> to vector<16x256xf32>
    %c0_8 = arith.constant 0 : index
    %c0_9 = arith.constant 0 : index
    %7 = vector.load %arg5[%c0_8, %c0_9] : memref<1x256xf32, #tpu.memory_space<vmem>>, vector<1x256xf32>
    %8 = vector.broadcast %7 : vector<1x256xf32> to vector<16x256xf32>
    %9 = arith.addf %6, %8 : vector<16x256xf32>
    %c0_10 = arith.constant 0 : index
    %c0_11 = arith.constant 0 : index
    %10 = vector.load %arg7[%c0_10, %c0_11] : memref<16x256xf32, #tpu.memory_space<vmem>>, vector<16x256xf32>
    tpu.vector_store %arg7[%c0_10, %c0_11], %9 {strides = array<i32>} : memref<16x256xf32, #tpu.memory_space<vmem>>, vector<16x256xf32>,
    %11 = vector.extract_strided_slice %5 {offsets = [0, 256], sizes = [16, 2], strides = [1, 1]} : vector<16x258xf32> to vector<16x2xf32>
    %12 = arith.addf %3, %11 : vector<16x2xf32>
    %c0_12 = arith.constant 0 : index
    %c0_13 = arith.constant 0 : index
    %13 = vector.load %arg6[%c0_12, %c0_13] : memref<1x2xf32, #tpu.memory_space<vmem>>, vector<1x2xf32>
    %14 = vector.broadcast %13 : vector<1x2xf32> to vector<16x2xf32>
    %15 = arith.addf %12, %14 : vector<16x2xf32>
    %c0_14 = arith.constant 0 : index
    %c0_15 = arith.constant 0 : index
    %16 = vector.load %arg8[%c0_14, %c0_15] : memref<16x2xf32, #tpu.memory_space<vmem>>, vector<16x2xf32>
    tpu.vector_store %arg8[%c0_14, %c0_15], %15 {strides = array<i32>} : memref<16x2xf32, #tpu.memory_space<vmem>>, vector<16x2xf32>,
    return
  }
  func.func @transform_0(%arg0: i32) -> (i32, i32) {
    %c0_i32 = arith.constant 0 : i32
    %c0_i32_0 = arith.constant 0 : i32
    return %arg0, %c0_i32 : i32, i32
  }
  func.func @transform_1(%arg0: i32) -> (i32, i32) {
    %c0_i32 = arith.constant 0 : i32
    %c0_i32_0 = arith.constant 0 : i32
    return %arg0, %c0_i32 : i32, i32
  }
  func.func @transform_2(%arg0: i32) -> (i32, i32) {
    %c0_i32 = arith.constant 0 : i32
    %c0_i32_0 = arith.constant 0 : i32
    %c0_i32_1 = arith.constant 0 : i32
    return %c0_i32, %c0_i32_0 : i32, i32
  }
  func.func @transform_3(%arg0: i32) -> (i32, i32) {
    %c0_i32 = arith.constant 0 : i32
    %c0_i32_0 = arith.constant 0 : i32
    %c0_i32_1 = arith.constant 0 : i32
    return %c0_i32, %c0_i32_0 : i32, i32
  }
  func.func @transform_4(%arg0: i32) -> (i32, i32) {
    %c0_i32 = arith.constant 0 : i32
    %c0_i32_0 = arith.constant 0 : i32
    %c0_i32_1 = arith.constant 0 : i32
    return %c0_i32, %c0_i32_0 : i32, i32
  }
  func.func @transform_5(%arg0: i32) -> (i32, i32) {
    %c0_i32 = arith.constant 0 : i32
    %c0_i32_0 = arith.constant 0 : i32
    %c0_i32_1 = arith.constant 0 : i32
    return %c0_i32, %c0_i32_0 : i32, i32
  }
  func.func @transform_6(%arg0: i32) -> (i32, i32) {
    %c0_i32 = arith.constant 0 : i32
    %c0_i32_0 = arith.constant 0 : i32
    return %arg0, %c0_i32 : i32, i32
  }
  func.func @transform_7(%arg0: i32) -> (i32, i32) {
    %c0_i32 = arith.constant 0 : i32
    %c0_i32_0 = arith.constant 0 : i32
    return %arg0, %c0_i32 : i32, i32
  }
}

module attributes {stable_mosaic.version = 11 : i64} {
  func.func @_bilstm_kernel(%arg0: memref<8x2x256xf32, #tpu.memory_space<vmem>>, %arg1: memref<8x2x1xf32, #tpu.memory_space<vmem>>, %arg2: memref<64x256xf32, #tpu.memory_space<vmem>>, %arg3: memref<1x64xf32, #tpu.memory_space<vmem>>, %arg4: memref<8x2xf32, #tpu.memory_space<vmem>>, %arg5: memref<8x2x32xf32, #tpu.memory_space<vmem>>, %arg6: memref<8x2x32xf32, #tpu.memory_space<vmem>>) attributes {dimension_semantics = [], scalar_prefetch = 0 : i64, scratch_operands = 2 : i64, tpu.core_type = #tpu.core_type<tc>} {
    %c0 = arith.constant 0 : index
    %c0_0 = arith.constant 0 : index
    %0 = vector.load %arg2[%c0, %c0_0] : memref<64x256xf32, #tpu.memory_space<vmem>>, vector<64x256xf32>
    %cst = arith.constant 0.000000e+00 : f32
    %1 = vector.broadcast %cst : f32 to vector<2x32xf32>
    %c0_i32 = arith.constant 0 : i32
    %c8_i32 = arith.constant 8 : i32
    %2 = arith.addi %c0_i32, %c8_i32 : i32
    %c1_i32 = arith.constant 1 : i32
    %3:4 = scf.for %arg7 = %c0_i32 to %2 step %c1_i32 iter_args(%arg8 = %1, %arg9 = %1, %arg10 = %1, %arg11 = %1) -> (vector<2x32xf32>, vector<2x32xf32>, vector<2x32xf32>, vector<2x32xf32>)  : i32 {
      %c7_i32 = arith.constant 7 : i32
      %19 = arith.subi %c7_i32, %arg7 : i32
      %20 = arith.index_cast %arg7 : i32 to index
      %c0_14 = arith.constant 0 : index
      %c0_15 = arith.constant 0 : index
      %21 = vector.load %arg0[%20, %c0_14, %c0_15] : memref<8x2x256xf32, #tpu.memory_space<vmem>>, vector<1x2x256xf32>
      %22 = vector.shape_cast %21 : vector<1x2x256xf32> to vector<2x256xf32>
      %23 = arith.index_cast %19 : i32 to index
      %c0_16 = arith.constant 0 : index
      %c0_17 = arith.constant 0 : index
      %24 = vector.load %arg0[%23, %c0_16, %c0_17] : memref<8x2x256xf32, #tpu.memory_space<vmem>>, vector<1x2x256xf32>
      %25 = vector.shape_cast %24 : vector<1x2x256xf32> to vector<2x256xf32>
      %26 = arith.index_cast %arg7 : i32 to index
      %c0_18 = arith.constant 0 : index
      %c0_19 = arith.constant 0 : index
      %27 = vector.load %arg1[%26, %c0_18, %c0_19] : memref<8x2x1xf32, #tpu.memory_space<vmem>>, vector<1x2x1xf32>
      %28 = vector.shape_cast %27 : vector<1x2x1xf32> to vector<2x1xf32>
      %29 = arith.index_cast %19 : i32 to index
      %c0_20 = arith.constant 0 : index
      %c0_21 = arith.constant 0 : index
      %30 = vector.load %arg1[%29, %c0_20, %c0_21] : memref<8x2x1xf32, #tpu.memory_space<vmem>>, vector<1x2x1xf32>
      %31 = vector.shape_cast %30 : vector<1x2x1xf32> to vector<2x1xf32>
      %32 = tpu.concatenate %arg8, %arg10 in 1 : vector<2x32xf32>, vector<2x32xf32> -> vector<2x64xf32>
      %cst_22 = arith.constant dense<0.000000e+00> : vector<2x256xf32>
      %33 = tpu.matmul %32, %0, %cst_22 {dimension_numbers = #tpu.dot_dimension_numbers<[1], [0], [0], [1], [0, 0, 1, 1], [], []>} : vector<2x64xf32>, vector<64x256xf32>, vector<2x256xf32> -> vector<2x256xf32>
      %34 = vector.extract_strided_slice %22 {offsets = [0, 0], sizes = [2, 128], strides = [1, 1]} : vector<2x256xf32> to vector<2x128xf32>
      %35 = vector.extract_strided_slice %33 {offsets = [0, 0], sizes = [2, 128], strides = [1, 1]} : vector<2x256xf32> to vector<2x128xf32>
      %36 = arith.addf %34, %35 : vector<2x128xf32>
      %37 = vector.extract_strided_slice %36 {offsets = [0, 0], sizes = [2, 32], strides = [1, 1]} : vector<2x128xf32> to vector<2x32xf32>
      %38 = arith.negf %37 : vector<2x32xf32>
      %39 = math.exp %38 : vector<2x32xf32>
      %cst_23 = arith.constant 1.000000e+00 : f32
      %40 = vector.broadcast %cst_23 : f32 to vector<2x32xf32>
      %41 = arith.addf %40, %39 : vector<2x32xf32>
      %42 = arith.divf %40, %41 : vector<2x32xf32>
      %43 = vector.extract_strided_slice %36 {offsets = [0, 32], sizes = [2, 32], strides = [1, 1]} : vector<2x128xf32> to vector<2x32xf32>
      %44 = arith.negf %43 : vector<2x32xf32>
      %45 = math.exp %44 : vector<2x32xf32>
      %cst_24 = arith.constant 1.000000e+00 : f32
      %46 = vector.broadcast %cst_24 : f32 to vector<2x32xf32>
      %47 = arith.addf %46, %45 : vector<2x32xf32>
      %48 = arith.divf %46, %47 : vector<2x32xf32>
      %49 = vector.extract_strided_slice %36 {offsets = [0, 64], sizes = [2, 32], strides = [1, 1]} : vector<2x128xf32> to vector<2x32xf32>
      %50 = math.tanh %49 : vector<2x32xf32>
      %51 = vector.extract_strided_slice %36 {offsets = [0, 96], sizes = [2, 32], strides = [1, 1]} : vector<2x128xf32> to vector<2x32xf32>
      %52 = arith.negf %51 : vector<2x32xf32>
      %53 = math.exp %52 : vector<2x32xf32>
      %cst_25 = arith.constant 1.000000e+00 : f32
      %54 = vector.broadcast %cst_25 : f32 to vector<2x32xf32>
      %55 = arith.addf %54, %53 : vector<2x32xf32>
      %56 = arith.divf %54, %55 : vector<2x32xf32>
      %57 = arith.mulf %48, %arg9 : vector<2x32xf32>
      %58 = arith.mulf %42, %50 : vector<2x32xf32>
      %59 = arith.addf %57, %58 : vector<2x32xf32>
      %60 = math.tanh %59 : vector<2x32xf32>
      %61 = arith.mulf %56, %60 : vector<2x32xf32>
      %62 = arith.subf %61, %arg8 : vector<2x32xf32>
      %63 = vector.broadcast %28 : vector<2x1xf32> to vector<2x32xf32>
      %64 = arith.mulf %63, %62 : vector<2x32xf32>
      %65 = arith.addf %arg8, %64 : vector<2x32xf32>
      %66 = arith.subf %59, %arg9 : vector<2x32xf32>
      %67 = vector.broadcast %28 : vector<2x1xf32> to vector<2x32xf32>
      %68 = arith.mulf %67, %66 : vector<2x32xf32>
      %69 = arith.addf %arg9, %68 : vector<2x32xf32>
      %70 = vector.extract_strided_slice %25 {offsets = [0, 128], sizes = [2, 128], strides = [1, 1]} : vector<2x256xf32> to vector<2x128xf32>
      %71 = vector.extract_strided_slice %33 {offsets = [0, 128], sizes = [2, 128], strides = [1, 1]} : vector<2x256xf32> to vector<2x128xf32>
      %72 = arith.addf %70, %71 : vector<2x128xf32>
      %73 = vector.extract_strided_slice %72 {offsets = [0, 0], sizes = [2, 32], strides = [1, 1]} : vector<2x128xf32> to vector<2x32xf32>
      %74 = arith.negf %73 : vector<2x32xf32>
      %75 = math.exp %74 : vector<2x32xf32>
      %cst_26 = arith.constant 1.000000e+00 : f32
      %76 = vector.broadcast %cst_26 : f32 to vector<2x32xf32>
      %77 = arith.addf %76, %75 : vector<2x32xf32>
      %78 = arith.divf %76, %77 : vector<2x32xf32>
      %79 = vector.extract_strided_slice %72 {offsets = [0, 32], sizes = [2, 32], strides = [1, 1]} : vector<2x128xf32> to vector<2x32xf32>
      %80 = arith.negf %79 : vector<2x32xf32>
      %81 = math.exp %80 : vector<2x32xf32>
      %cst_27 = arith.constant 1.000000e+00 : f32
      %82 = vector.broadcast %cst_27 : f32 to vector<2x32xf32>
      %83 = arith.addf %82, %81 : vector<2x32xf32>
      %84 = arith.divf %82, %83 : vector<2x32xf32>
      %85 = vector.extract_strided_slice %72 {offsets = [0, 64], sizes = [2, 32], strides = [1, 1]} : vector<2x128xf32> to vector<2x32xf32>
      %86 = math.tanh %85 : vector<2x32xf32>
      %87 = vector.extract_strided_slice %72 {offsets = [0, 96], sizes = [2, 32], strides = [1, 1]} : vector<2x128xf32> to vector<2x32xf32>
      %88 = arith.negf %87 : vector<2x32xf32>
      %89 = math.exp %88 : vector<2x32xf32>
      %cst_28 = arith.constant 1.000000e+00 : f32
      %90 = vector.broadcast %cst_28 : f32 to vector<2x32xf32>
      %91 = arith.addf %90, %89 : vector<2x32xf32>
      %92 = arith.divf %90, %91 : vector<2x32xf32>
      %93 = arith.mulf %84, %arg11 : vector<2x32xf32>
      %94 = arith.mulf %78, %86 : vector<2x32xf32>
      %95 = arith.addf %93, %94 : vector<2x32xf32>
      %96 = math.tanh %95 : vector<2x32xf32>
      %97 = arith.mulf %92, %96 : vector<2x32xf32>
      %98 = arith.subf %97, %arg10 : vector<2x32xf32>
      %99 = vector.broadcast %31 : vector<2x1xf32> to vector<2x32xf32>
      %100 = arith.mulf %99, %98 : vector<2x32xf32>
      %101 = arith.addf %arg10, %100 : vector<2x32xf32>
      %102 = arith.subf %95, %arg11 : vector<2x32xf32>
      %103 = vector.broadcast %31 : vector<2x1xf32> to vector<2x32xf32>
      %104 = arith.mulf %103, %102 : vector<2x32xf32>
      %105 = arith.addf %arg11, %104 : vector<2x32xf32>
      %106 = vector.broadcast %28 : vector<2x1xf32> to vector<2x32xf32>
      %107 = arith.mulf %106, %65 : vector<2x32xf32>
      %108 = arith.index_cast %arg7 : i32 to index
      %c0_29 = arith.constant 0 : index
      %c0_30 = arith.constant 0 : index
      %109 = vector.load %arg5[%108, %c0_29, %c0_30] : memref<8x2x32xf32, #tpu.memory_space<vmem>>, vector<1x2x32xf32>
      %110 = vector.shape_cast %109 : vector<1x2x32xf32> to vector<2x32xf32>
      %111 = vector.shape_cast %107 : vector<2x32xf32> to vector<1x2x32xf32>
      tpu.vector_store %arg5[%108, %c0_29, %c0_30], %111 {strides = array<i32>} : memref<8x2x32xf32, #tpu.memory_space<vmem>>, vector<1x2x32xf32>,
      %112 = vector.broadcast %31 : vector<2x1xf32> to vector<2x32xf32>
      %113 = arith.mulf %112, %101 : vector<2x32xf32>
      %114 = arith.index_cast %19 : i32 to index
      %c0_31 = arith.constant 0 : index
      %c0_32 = arith.constant 0 : index
      %115 = vector.load %arg6[%114, %c0_31, %c0_32] : memref<8x2x32xf32, #tpu.memory_space<vmem>>, vector<1x2x32xf32>
      %116 = vector.shape_cast %115 : vector<1x2x32xf32> to vector<2x32xf32>
      %117 = vector.shape_cast %113 : vector<2x32xf32> to vector<1x2x32xf32>
      tpu.vector_store %arg6[%114, %c0_31, %c0_32], %117 {strides = array<i32>} : memref<8x2x32xf32, #tpu.memory_space<vmem>>, vector<1x2x32xf32>,
      scf.yield %65, %69, %101, %105 : vector<2x32xf32>, vector<2x32xf32>, vector<2x32xf32>, vector<2x32xf32>
    }
    %c8_i32_1 = arith.constant 8 : i32
    %c0_2 = arith.constant 0 : index
    %c0_3 = arith.constant 0 : index
    %4 = vector.load %arg3[%c0_2, %c0_3] : memref<1x64xf32, #tpu.memory_space<vmem>>, vector<1x64xf32>
    %5 = vector.extract_strided_slice %4 {offsets = [0, 0], sizes = [1, 32], strides = [1, 1]} : vector<1x64xf32> to vector<1x32xf32>
    %6 = vector.shape_cast %5 : vector<1x32xf32> to vector<1x1x32xf32>
    %7 = vector.extract_strided_slice %4 {offsets = [0, 32], sizes = [1, 32], strides = [1, 1]} : vector<1x64xf32> to vector<1x32xf32>
    %8 = vector.shape_cast %7 : vector<1x32xf32> to vector<1x1x32xf32>
    %c0_4 = arith.constant 0 : index
    %c0_5 = arith.constant 0 : index
    %c0_6 = arith.constant 0 : index
    %9 = vector.load %arg5[%c0_4, %c0_5, %c0_6] : memref<8x2x32xf32, #tpu.memory_space<vmem>>, vector<8x2x32xf32>
    %10 = vector.broadcast %6 : vector<1x1x32xf32> to vector<8x2x32xf32>
    %11 = arith.mulf %9, %10 : vector<8x2x32xf32>
    %cst_7 = arith.constant dense<0.000000e+00> : vector<8x2xf32>
    %12 = vector.multi_reduction <add>, %11, %cst_7 [2] : vector<8x2x32xf32> to vector<8x2xf32>
    %c0_8 = arith.constant 0 : index
    %c0_9 = arith.constant 0 : index
    %c0_10 = arith.constant 0 : index
    %13 = vector.load %arg6[%c0_8, %c0_9, %c0_10] : memref<8x2x32xf32, #tpu.memory_space<vmem>>, vector<8x2x32xf32>
    %14 = vector.broadcast %8 : vector<1x1x32xf32> to vector<8x2x32xf32>
    %15 = arith.mulf %13, %14 : vector<8x2x32xf32>
    %cst_11 = arith.constant dense<0.000000e+00> : vector<8x2xf32>
    %16 = vector.multi_reduction <add>, %15, %cst_11 [2] : vector<8x2x32xf32> to vector<8x2xf32>
    %17 = arith.addf %12, %16 : vector<8x2xf32>
    %c0_12 = arith.constant 0 : index
    %c0_13 = arith.constant 0 : index
    %18 = vector.load %arg4[%c0_12, %c0_13] : memref<8x2xf32, #tpu.memory_space<vmem>>, vector<8x2xf32>
    tpu.vector_store %arg4[%c0_12, %c0_13], %17 {strides = array<i32>} : memref<8x2xf32, #tpu.memory_space<vmem>>, vector<8x2xf32>,
    return
  }
}

module attributes {stable_mosaic.version = 11 : i64} {
  func.func @_pointer_kernel(%arg0: memref<2x8xf32, #tpu.memory_space<vmem>>, %arg1: memref<2x8xf32, #tpu.memory_space<vmem>>, %arg2: memref<2x8xf32, #tpu.memory_space<vmem>>, %arg3: memref<2x8xf32, #tpu.memory_space<vmem>>, %arg4: memref<2x8xf32, #tpu.memory_space<vmem>>, %arg5: memref<2x8xf32, #tpu.memory_space<vmem>>) attributes {dimension_semantics = [], scalar_prefetch = 0 : i64, scratch_operands = 0 : i64, tpu.core_type = #tpu.core_type<tc>} {
    %c0 = arith.constant 0 : index
    %c0_0 = arith.constant 0 : index
    %0 = vector.load %arg3[%c0, %c0_0] : memref<2x8xf32, #tpu.memory_space<vmem>>, vector<2x8xf32>
    %cst = arith.constant 1.000000e+00 : f32
    %1 = vector.broadcast %cst : f32 to vector<2x8xf32>
    %2 = arith.subf %1, %0 : vector<2x8xf32>
    %c0_1 = arith.constant 0 : index
    %c0_2 = arith.constant 0 : index
    %3 = vector.load %arg0[%c0_1, %c0_2] : memref<2x8xf32, #tpu.memory_space<vmem>>, vector<2x8xf32>
    %4 = arith.mulf %0, %3 : vector<2x8xf32>
    %cst_3 = arith.constant -1.000000e+30 : f32
    %5 = vector.broadcast %cst_3 : f32 to vector<2x8xf32>
    %6 = arith.mulf %2, %5 : vector<2x8xf32>
    %7 = arith.addf %4, %6 : vector<2x8xf32>
    %cst_4 = arith.constant dense<0xFF800000> : vector<2xf32>
    %8 = vector.multi_reduction <maximumf>, %7, %cst_4 [1] : vector<2x8xf32> to vector<2xf32>
    %9 = vector.shape_cast %8 : vector<2xf32> to vector<2x1xf32>
    %10 = vector.broadcast %9 : vector<2x1xf32> to vector<2x8xf32>
    %11 = arith.subf %7, %10 : vector<2x8xf32>
    %12 = math.exp %11 : vector<2x8xf32>
    %cst_5 = arith.constant dense<0.000000e+00> : vector<2xf32>
    %13 = vector.multi_reduction <add>, %12, %cst_5 [1] : vector<2x8xf32> to vector<2xf32>
    %14 = vector.shape_cast %13 : vector<2xf32> to vector<2x1xf32>
    %15 = math.log %14 : vector<2x1xf32>
    %16 = arith.addf %9, %15 : vector<2x1xf32>
    %17 = vector.broadcast %16 : vector<2x1xf32> to vector<2x8xf32>
    %18 = arith.subf %7, %17 : vector<2x8xf32>
    %c0_6 = arith.constant 0 : index
    %c0_7 = arith.constant 0 : index
    %19 = vector.load %arg4[%c0_6, %c0_7] : memref<2x8xf32, #tpu.memory_space<vmem>>, vector<2x8xf32>
    tpu.vector_store %arg4[%c0_6, %c0_7], %18 {strides = array<i32>} : memref<2x8xf32, #tpu.memory_space<vmem>>, vector<2x8xf32>,
    %c0_8 = arith.constant 0 : index
    %c0_9 = arith.constant 0 : index
    %20 = vector.load %arg1[%c0_8, %c0_9] : memref<2x8xf32, #tpu.memory_space<vmem>>, vector<2x8xf32>
    %c0_10 = arith.constant 0 : index
    %c0_11 = arith.constant 0 : index
    %21 = vector.load %arg2[%c0_10, %c0_11] : memref<2x8xf32, #tpu.memory_space<vmem>>, vector<2x8xf32>
    %22 = arith.addf %20, %21 : vector<2x8xf32>
    %23 = arith.mulf %0, %22 : vector<2x8xf32>
    %cst_12 = arith.constant -1.000000e+30 : f32
    %24 = vector.broadcast %cst_12 : f32 to vector<2x8xf32>
    %25 = arith.mulf %2, %24 : vector<2x8xf32>
    %26 = arith.addf %23, %25 : vector<2x8xf32>
    %cst_13 = arith.constant dense<0xFF800000> : vector<2xf32>
    %27 = vector.multi_reduction <maximumf>, %26, %cst_13 [1] : vector<2x8xf32> to vector<2xf32>
    %28 = vector.shape_cast %27 : vector<2xf32> to vector<2x1xf32>
    %29 = vector.broadcast %28 : vector<2x1xf32> to vector<2x8xf32>
    %30 = arith.subf %26, %29 : vector<2x8xf32>
    %31 = math.exp %30 : vector<2x8xf32>
    %cst_14 = arith.constant dense<0.000000e+00> : vector<2xf32>
    %32 = vector.multi_reduction <add>, %31, %cst_14 [1] : vector<2x8xf32> to vector<2xf32>
    %33 = vector.shape_cast %32 : vector<2xf32> to vector<2x1xf32>
    %34 = math.log %33 : vector<2x1xf32>
    %35 = arith.addf %28, %34 : vector<2x1xf32>
    %36 = vector.broadcast %35 : vector<2x1xf32> to vector<2x8xf32>
    %37 = arith.subf %26, %36 : vector<2x8xf32>
    %c0_15 = arith.constant 0 : index
    %c0_16 = arith.constant 0 : index
    %38 = vector.load %arg5[%c0_15, %c0_16] : memref<2x8xf32, #tpu.memory_space<vmem>>, vector<2x8xf32>
    tpu.vector_store %arg5[%c0_15, %c0_16], %37 {strides = array<i32>} : memref<2x8xf32, #tpu.memory_space<vmem>>, vector<2x8xf32>,
    return
  }
}

</mosaic_0001>

<bundles_post_ra>
// kernel: squeeze.2
= control target key start
LH: loop header
LB: loop body
LE: loop exit
PB: predicated region body
PF: predicated region fallthrough
CT: control target
= control target key end

     0   :  { %vm7_vm0 = vcmask 64512   ;;  %s39_s0 = inlined_call_operand.vmem [shape: f32[16], index: 0, kind: input, shape index: {}]   ;;  %s40_s1 = inlined_call_operand.vmem [shape: f32[2,8], index: 1, kind: output, shape index: {}]  }
   0x1   :  { %v4_v0 = vld [vmem:[%s39_s0] sm:$0x1]  ;;  %s22_s0 = smov 120  }
   0x2   :  { %5 = vst [vmem:[#allocation1] sm:$0x1] %v4_v0 }
   0x9   :  { %v9_v1 = vld [vmem:[#allocation1] sm:$0x1]  }
   0xa   :  { %v6_v2 = vld [vmem:[#allocation1] sm:$0x1]   ;;  %10 = vrot.lane.b32.xlu0 %v9_v1, %s22_s0 }
   0xb   :  { %8 = vst.msk [vmem:[#allocation0] sm:$0x1] %vm7_vm0, %v6_v2  }
  0x7c   :  { %v11_v3 = vpop.permute.xlu0 %10  }
  0x7d   :  { %14 = vst.msk [vmem:[#allocation0 + $0x1] sm:$0x1] %vm7_vm0, %v11_v3  }
  0x84   :  { %v17_v4 = vld [vmem:[#allocation0] sm:$0x3] }
  0x85   :  { %20 = vst [vmem:[%s40_s1] sm:$0x3] %v17_v4 }

// kernel: bidaf_output_forward.3
= control target key start
LH: loop header
LB: loop body
LE: loop exit
PB: predicated region body
PF: predicated region fallthrough
CT: control target
= control target key end

     0   :  { %vm87_vm0 = vcmask 523264   ;;  %vm229_vm1 = vcmask 15360   ;;  %s508_s2 = inlined_call_operand.vmem [shape: f32[256,2], index: 2, kind: input, shape index: {}]   ;;  %s509_s3 = inlined_call_operand.vmem [shape: f32[64,258], index: 3, kind: input, shape index: {}]   ;;  %s510_s1 = inlined_call_operand.vmem [shape: f32[16,64], index: 1, kind: input, shape index: {}]   ;;  %s511_s0 = inlined_call_operand.vmem [shape: f32[16,256], index: 0, kind: input, shape index: {}]   ;;  %s512_s5 = inlined_call_operand.vmem [shape: f32[1,2], index: 5, kind: input, shape index: {}]   ;;  %s513_s4 = inlined_call_operand.vmem [shape: f32[1,256], index: 4, kind: input, shape index: {}]   ;;  %s514_s6 = inlined_call_operand.vmem [shape: f32[16,256], index: 6, kind: output, shape index: {0}]   ;;  %s515_s7 = inlined_call_operand.vmem [shape: f32[16,2], index: 7, kind: output, shape index: {1}]  }
   0x1   :  { %v46_v0 = vld [vmem:[%s508_s2 + $0x78] sm:$0xff]  ;;  %v45_v1 = vld [vmem:[%s508_s2 + $0x70] sm:$0xff]  ;;  %v44_v3 = vld [vmem:[%s508_s2 + $0x68] sm:$0xff] }
   0x2   :  { %177 = vmatpush.msra.mxu3 %v46_v0  ;;  %v62_v2 = vld [vmem:[%s508_s2 + $0xf8] sm:$0xff]  ;;  %v84_v4 = vld [vmem:[%s509_s3 + $0xa8] sm:$0xff]  ;;  %v61_v5 = vld [vmem:[%s508_s2 + $0xf0] sm:$0xff] }
   0x3   :  { %200 = vmatpush.msra.mxu0 %v62_v2  ;;  %102 = vmatpush.msra.mxu1 %v84_v4  ;;  %v81_v6 = vld [vmem:[%s509_s3 + $0x90] sm:$0xff]  ;;  %v60_v7 = vld [vmem:[%s508_s2 + $0xe8] sm:$0xff]  ;;  %v43_v8 = vld [vmem:[%s508_s2 + $0x60] sm:$0xff] }
   0x4   :  { %178 = vmatpush.msra.mxu3 %v45_v1  ;;  %v78_v9 = vld [vmem:[%s509_s3 + $0x78] sm:$0xff]  ;;  %v59_v10 = vld [vmem:[%s508_s2 + $0xe0] sm:$0xff]  ;;  %v41_v16 = vld [vmem:[%s508_s2 + $0x50] sm:$0xff] }
   0x5   :  { %201 = vmatpush.msra.mxu0 %v61_v5  ;;  %103 = vmatpush.msra.mxu1 %v81_v6  ;;  %v86_v11 = vld [vmem:[%s509_s3 + $0xb8] sm:$0xff]  ;;  %v75_v13 = vld [vmem:[%s509_s3 + $0x60] sm:$0xff]  ;;  %v72_v17 = vld [vmem:[%s509_s3 + $0x48] sm:$0xff] }
   0x6   :  { %179 = vmatpush.msra.mxu3 %v44_v3  ;;  %v42_v12 = vld [vmem:[%s508_s2 + $0x58] sm:$0xff]  ;;  %148 = vmatpush.msra.mxu2 %v86_v11  ;;  %v83_v14 = vld [vmem:[%s509_s3 + $0xa0] sm:$0xff]  ;;  %v80_v18 = vld [vmem:[%s509_s3 + $0x88] sm:$0xff] }
   0x7   :  { %202 = vmatpush.msra.mxu0 %v60_v7  ;;  %104 = vmatpush.msra.mxu1 %v78_v9  ;;  %v58_v15 = vld [vmem:[%s508_s2 + $0xd8] sm:$0xff]  ;;  %v57_v19 = vld [vmem:[%s508_s2 + $0xd0] sm:$0xff]  ;;  %v40_v21 = vld [vmem:[%s508_s2 + $0x48] sm:$0xff] }
   0x8   :  { %180 = vmatpush.msra.mxu3 %v43_v8  ;;  %149 = vmatpush.msra.mxu2 %v83_v14  ;;  %v77_v20 = vld [vmem:[%s509_s3 + $0x70] sm:$0xff]  ;;  %v56_v23 = vld [vmem:[%s508_s2 + $0xc8] sm:$0xff]  ;;  %v74_v24 = vld [vmem:[%s509_s3 + $0x58] sm:$0xff] }
   0x9   :  { %203 = vmatpush.msra.mxu0 %v59_v10  ;;  %105 = vmatpush.msra.mxu1 %v75_v13  ;;  %v69_v22 = vld [vmem:[%s509_s3 + $0x30] sm:$0xff]  ;;  %v39_v25 = vld [vmem:[%s508_s2 + $0x40] sm:$0xff]  ;;  %v66_v26 = vld [vmem:[%s509_s3 + $0x18] sm:$0xff] }
   0xa   :  { %181 = vmatpush.msra.mxu3 %v42_v12  ;;  %150 = vmatpush.msra.mxu2 %v80_v18  ;;  %v55_v27 = vld [vmem:[%s508_s2 + $0xc0] sm:$0xff]  ;;  %v38_v29 = vld [vmem:[%s508_s2 + $0x38] sm:$0xff]  ;;  %v37_v33 = vld [vmem:[%s508_s2 + $0x30] sm:$0xff] }
   0xb   :  { %204 = vmatpush.msra.mxu0 %v58_v15  ;;  %106 = vmatpush.msra.mxu1 %v72_v17  ;;  %v71_v28 = vld [vmem:[%s509_s3 + $0x40] sm:$0xff]  ;;  %v54_v31 = vld [vmem:[%s508_s2 + $0xb8] sm:$0xff]  ;;  %v85_v34 = vld [vmem:[%s509_s3 + $0xb0] sm:$0xff] }
   0xc   :  { %182 = vmatpush.msra.mxu3 %v41_v16  ;;  %151 = vmatpush.msra.mxu2 %v77_v20  ;;  %v63_v30 = vld [vmem:[%s509_s3] sm:$0xff]  ;;  %v53_v35 = vld [vmem:[%s508_s2 + $0xb0] sm:$0xff]  ;;  %v68_v36 = vld [vmem:[%s509_s3 + $0x28] sm:$0xff] }
   0xd   :  { %205 = vmatpush.msra.mxu0 %v57_v19  ;;  %107 = vmatpush.msra.mxu1 %v69_v22  ;;  %v386_v32 = vld [vmem:[%s510_s1] sm:$0xff]  ;;  %v36_v37 = vld [vmem:[%s508_s2 + $0x28] sm:$0xff]  ;;  %v82_v38 = vld [vmem:[%s509_s3 + $0x98] sm:$0xff] }
   0xe   :  { %183 = vmatpush.msra.mxu3 %v40_v21  ;;  %152 = vmatpush.msra.mxu2 %v74_v24  ;;  %v52_v39 = vld [vmem:[%s508_s2 + $0xa8] sm:$0xff]  ;;  %v65_v40 = vld [vmem:[%s509_s3 + $0x10] sm:$0xff]  ;;  %v35_v41 = vld [vmem:[%s508_s2 + $0x20] sm:$0xff] }
   0xf   :  { %206 = vmatpush.msra.mxu0 %v56_v23  ;;  %108 = vmatpush.msra.mxu1 %v66_v26  ;;  %v79_v42 = vld [vmem:[%s509_s3 + $0x80] sm:$0xff]  ;;  %v34_v44 = vld [vmem:[%s508_s2 + $0x18] sm:$0xff]  ;;  %v76_v45 = vld [vmem:[%s509_s3 + $0x68] sm:$0xff] }
  0x10   :  { %184 = vmatpush.msra.mxu3 %v39_v25  ;;  %153 = vmatpush.msra.mxu2 %v71_v28  ;;  %v51_v43 = vld [vmem:[%s508_s2 + $0xa0] sm:$0xff]  ;;  %v50_v46 = vld [vmem:[%s508_s2 + $0x98] sm:$0xff]  ;;  %v30_v47 = vld [vmem:[%s510_s1 + $0x8] sm:$0xff] }
  0x11   :  { %207 = vmatpush.msra.mxu0 %v55_v27  ;;  %109 = vmatpush.msra.mxu1 %v63_v30  ;;  %v33_v48 = vld [vmem:[%s508_s2 + $0x10] sm:$0xff]  ;;  %v32_v51 = vld [vmem:[%s508_s2 + $0x8] sm:$0xff]  ;;  %v70_v52 = vld [vmem:[%s509_s3 + $0x38] sm:$0xff] }
  0x12   :  { %185 = vmatpush.msra.mxu3 %v38_v29  ;;  %240 = vmatmul.msk.f32.vlgmr.msra.gmra.mxu1 %vm87_vm0, %v386_v32  ;;  %v73_v49 = vld [vmem:[%s509_s3 + $0x50] sm:$0xff]  ;;  %v48_v53 = vld [vmem:[%s508_s2 + $0x88] sm:$0xff]  ;;  %v31_v54 = vld [vmem:[%s508_s2] sm:$0xff] }
  0x13   :  { %208 = vmatpush.msra.mxu0 %v54_v31  ;;  %125 = vmatpush.msrb.mxu1 %v85_v34  ;;  %v49_v50 = vld [vmem:[%s508_s2 + $0x90] sm:$0xff]  ;;  %v67_v55 = vld [vmem:[%s509_s3 + $0x20] sm:$0xff]  ;;  %v64_v58 = vld [vmem:[%s509_s3 + $0x8] sm:$0xff] }
  0x14   :  { %186 = vmatpush.msra.mxu3 %v37_v33  ;;  %154 = vmatpush.msra.mxu2 %v68_v36  ;;  %v25_v56 = vld [vmem:[%s511_s0] sm:$0xff]  ;;  %v26_v59 = vld [vmem:[%s511_s0 + $0x8] sm:$0xff]  ;;  %v27_v60 = vld [vmem:[%s511_s0 + $0x10] sm:$0xff] }
  0x15   :  { %209 = vmatpush.msra.mxu0 %v53_v35  ;;  %126 = vmatpush.msrb.mxu1 %v82_v38  ;;  %v47_v57 = vld [vmem:[%s508_s2 + $0x80] sm:$0xff]  ;;  %v28_v61 = vld [vmem:[%s511_s0 + $0x18] sm:$0xff] }
  0x16   :  { %187 = vmatpush.msra.mxu3 %v36_v37  ;;  %155 = vmatpush.msra.mxu2 %v65_v40  ;;  %v163_v62 = vld [vmem:[%s513_s4] sm:$0x3] }
  0x17   :  { %210 = vmatpush.msra.mxu0 %v52_v39  ;;  %127 = vmatpush.msrb.mxu1 %v79_v42  ;;  %v165_v63 = vperm.slane %v163_v62, 0  ;;  %v166_v4 = vperm.slane %v163_v62, 1  ;;  %v246_v11 = vld [vmem:[%s512_s5] ss:$0 sm:$0xff] }
  0x18   :  { %188 = vmatpush.msra.mxu3 %v35_v41  ;;  %244 = vmatmul.msk.f32.vlgmr.msra.gmra.mxu2 %vm87_vm0, %v386_v32 }
  0x19   :  { %211 = vmatpush.msra.mxu0 %v51_v43  ;;  %128 = vmatpush.msrb.mxu1 %v76_v45 }
  0x1a   :  { %189 = vmatpush.msra.mxu3 %v34_v44  ;;  %241 = vmatmul.msk.f32.gmra.mxu1 %vm87_vm0, %v30_v47 }
  0x1b   :  { %212 = vmatpush.msra.mxu0 %v50_v46  ;;  %129 = vmatpush.msrb.mxu1 %v73_v49 }
  0x1c   :  { %190 = vmatpush.msra.mxu3 %v33_v48 }
  0x1d   :  { %213 = vmatpush.msra.mxu0 %v49_v50  ;;  %130 = vmatpush.msrb.mxu1 %v70_v52 }
  0x1e   :  { %191 = vmatpush.msra.mxu3 %v32_v51 }
  0x1f   :  { %214 = vmatpush.msra.mxu0 %v48_v53  ;;  %131 = vmatpush.msrb.mxu1 %v67_v55 }
  0x20   :  { %192 = vmatpush.msra.mxu3 %v31_v54  ;;  %245 = vmatmul.msk.f32.gmra.mxu2 %vm87_vm0, %v30_v47 }
  0x21   :  { %193 = vmatmul.f32.vlgmr.msra.gmra.mxu3 %v25_v56  ;;  %215 = vmatpush.msra.mxu0 %v47_v57 }
  0x22   :  { %132 = vmatpush.msrb.mxu1 %v64_v58  ;;  %216 = vmatmul.f32.vlgmr.msra.gmra.mxu0 %v26_v59 }
  0x23   :  { %242 = vmatmul.msk.f32.vlgmr.msrb.gmra.mxu1 %vm87_vm0, %v386_v32 }
  0x29   :  { %196 = vmatmul.f32.gmra.mxu3 %v27_v60 }
  0x2a   :  { %219 = vmatmul.f32.gmra.mxu0 %v28_v61 }
  0x2b   :  { %243 = vmatmul.msk.f32.gmra.mxu1 %vm87_vm0, %v30_v47 }
  0x8f   :  { %v111_v0 = vpop.f32.mrf.mxu1 }
  0x90   :  { %v169_v1 = vadd.f32 %v165_v63, %v111_v0 }
  0x92   :  { %173 = vst [vmem:[%s514_s6] sm:$0xff] %v169_v1 }
  0x97   :  { %v114_v2 = vpop.f32.mrf.mxu1 }
  0x98   :  { %v171_v3 = vadd.f32 %v165_v63, %v114_v2 }
  0x9a   :  { %175 = vst [vmem:[%s514_s6 + $0x10] sm:$0xff] %v171_v3 }
  0x9b   :  { %v157_v5 = vpop.f32.mrf.mxu2 }
  0x9f   :  { %v217_v8 = vpop.f32.mrf.mxu0 }
  0xa0   :  { %v134_v6 = vpop.f32.mrf.mxu1 }
  0xa1   :  { %v170_v7 = vadd.f32 %v166_v4, %v134_v6 }
  0xa3   :  { %174 = vst [vmem:[%s514_s6 + $0x8] sm:$0xff] %v170_v7  ;;  %v160_v16 = vpop.f32.mrf.mxu2 }
  0xa4   :  { %v194_v9 = vpop.f32.mrf.mxu3 }
  0xa5   :  { %v195_v10 = vadd.f32 %v194_v9, %v157_v5 }
  0xa7   :  { %v218_v12 = vadd.f32 %v217_v8, %v195_v10  ;;  %v220_v18 = vpop.f32.mrf.mxu0 }
  0xa8   :  { %v137_v13 = vpop.f32.mrf.mxu1 }
  0xa9   :  { %v227_v14 = vadd.f32 %v246_v11, %v218_v12  ;;  %v172_v15 = vadd.f32 %v166_v4, %v137_v13 }
  0xab   :  { %230 = vst.msk [vmem:[%s515_s7] sm:$0xff] %vm229_vm1, %v227_v14 }
  0xac   :  { %v197_v17 = vpop.f32.mrf.mxu3  ;;  %176 = vst [vmem:[%s514_s6 + $0x18] sm:$0xff] %v172_v15 }
  0xad   :  { %v198_v19 = vadd.f32 %v197_v17, %v160_v16 }
  0xaf   :  { %v221_v20 = vadd.f32 %v220_v18, %v198_v19 }
  0xb1   :  { %v228_v21 = vadd.f32 %v246_v11, %v221_v20 }
  0xb3   :  { %231 = vst.msk [vmem:[%s515_s7 + $0x8] sm:$0xff] %vm229_vm1, %v228_v21 }

// kernel: bidaf_output_forward.5
= control target key start
LH: loop header
LB: loop body
LE: loop exit
PB: predicated region body
PF: predicated region fallthrough
CT: control target
= control target key end

     0   :  { %11 = vsyncpa [#allocation3], 0  ;;  %s211_s0 = inlined_call_operand.vmem [shape: f32[2,8], index: 0, kind: input, shape index: {}]   ;;  %s212_s1 = inlined_call_operand.vmem [shape: f32[2,8], index: 1, kind: input, shape index: {}]   ;;  %s213_s2 = inlined_call_operand.vmem [shape: f32[2,8], index: 2, kind: input, shape index: {}]   ;;  %s214_s3 = inlined_call_operand.vmem [shape: f32[2,8], index: 3, kind: input, shape index: {}]   ;;  %s215_s4 = inlined_call_operand.hbm [shape: f32[2,8], index: 4, kind: output, shape index: {0}]   ;;  %s216_s5 = inlined_call_operand.hbm [shape: f32[2,8], index: 5, kind: output, shape index: {1}]  }
   0x1   :  { %v21_v0 = vld [vmem:[%s214_s3] sm:$0x3] }
   0x2   :  { %v23_v1 = vld [vmem:[%s211_s0] sm:$0x3]  ;;  %v22_v2 = vsub.f32 1.0, %v21_v0 }
   0x3   :  { %v24_v3 = vmul.f32 %v23_v1, %v21_v0  ;;  %v42_v4 = vld [vmem:[%s212_s1] sm:$0x3] }
   0x4   :  { %v43_v5 = vld [vmem:[%s213_s2] sm:$0x3] }
   0x5   :  { %v44_v6 = vadd.f32 %v43_v5, %v42_v4 }
   0x6   :  { %12 = vsyncpa [#allocation5], 0  ;;  %v25_v7 = vmul.f32 -1e+30, %v22_v2  ;;  %vm27_vm0 = vcmask 58368   ;;  %s155_s0 = smov [#allocation2]  }
   0x7   :  { %v45_v9 = vmul.f32 %v44_v6, %v21_v0  ;;  %s66_s1 = sshll.u32 %s155_s0, 4  ;;  %s68_s26 = sshll.u32 %s215_s4, 4  ;;  %s67_s1 = int_to_ptr.vmem [resolvable:$true] %s66_s1  ;;  %s69_s26 = int_to_ptr.hbm [resolvable:$true] %s68_s26 }
   0x8   :  { %v26_v8 = vadd.f32 %v25_v7, %v24_v3  ;;  %s156_s27 = smov [#allocation4]   ;;  %s79_s6 = sshll.u32 %s216_s5, 4  ;;  %s80_s6 = int_to_ptr.hbm [resolvable:$true] %s79_s6 }
   0x9   :  { %v46_v11 = vadd.f32 %v45_v9, %v25_v7  ;;  %s77_s28 = sshll.u32 %s156_s27, 4  ;;  %s78_s28 = int_to_ptr.vmem [resolvable:$true] %s77_s28 }
   0xa   :  { %v28_v10 = vsel %vm27_vm0, %v26_v8, -inf }
   0xb   :  { %29 = vmax.xlane.f32.xlu0 %v28_v10  ;;  %v47_v12 = vsel %vm27_vm0, %v46_v11, -inf }
  0x13   :  { %48 = vmax.xlane.f32.xlu0 %v47_v12 }
  0x7e   :  { %v30_v13 = vpop.xlane.xlu0 %29 }
  0x7f   :  { %v31_v14 = vsub.f32 %v26_v8, %v30_v13 }
  0x81   :  { %v32_v15 = vmul.f32 1.442695, %v31_v14 }
  0x83   :  { %95 = vpow2.f32 %v32_v15 }
  0x86   :  { %v49_v16 = vpop.xlane.xlu0 %48 }
  0x87   :  { %v50_v17 = vsub.f32 %v46_v11, %v49_v16 }
  0x89   :  { %v96_v18 = vpop.eup %95  ;;  %v51_v19 = vmul.f32 1.442695, %v50_v17 }
  0x8a   :  { %v34_v20 = vsel %vm27_vm0, %v96_v18, 0.0 }
  0x8b   :  { %97 = vpow2.f32 %v51_v19  ;;  %35 = vadd.xlane.f32.xlu1 %v34_v20 }
  0x91   :  { %v98_v21 = vpop.eup %97 }
  0x92   :  { %v53_v22 = vsel %vm27_vm0, %v98_v21, 0.0 }
  0x93   :  { %54 = vadd.xlane.f32.xlu1 %v53_v22 }
  0xfe   :  { %v36_v23 = vpop.xlane.xlu1 %35 }
  0xff   :  { %99 = vlog2.f32 %v36_v23 }
 0x105   :  { %v100_v24 = vpop.eup %99 }
 0x106   :  { %v38_v25 = vmul.f32 0.6931472, %v100_v24  ;;  %v55_v26 = vpop.xlane.xlu1 %54 }
 0x107   :  { %101 = vlog2.f32 %v55_v26 }
 0x108   :  { %v39_v27 = vadd.f32 %v38_v25, %v30_v13 }
 0x10a   :  { %v40_v28 = vsub.f32 %v26_v8, %v39_v27 }
 0x10c   :  { %41 = vst.msk [vmem:[#allocation2] sm:$0x3] %vm27_vm0, %v40_v28 }
 0x10d   :  { %v102_v29 = vpop.eup %101  ;;  %71 = dma.vmem_to_hbm [thread:$0]  %s67_s1, 32, %s69_s26, [#allocation3]  }
 0x10e   :  { %v57_v30 = vmul.f32 0.6931472, %v102_v29 }
 0x110   :  { %v58_v31 = vadd.f32 %v57_v30, %v49_v16 }
 0x112   :  { %v59_v32 = vsub.f32 %v46_v11, %v58_v31 }
 0x114   :  { %60 = vst.msk [vmem:[#allocation4] sm:$0x3] %vm27_vm0, %v59_v32 }
 0x115   :  { %82 = dma.vmem_to_hbm [thread:$0]  %s78_s28, 32, %s80_s6, [#allocation5]  }
 0x116   :  { %151 = dma.done.wait [#allocation3], 32  }
 0x117   :  { %152 = vsyncadd [#allocation3], 4294967264 }
 0x118   :  { %153 = dma.done.wait [#allocation5], 32  }
 0x119   :  { %154 = vsyncadd [#allocation5], 4294967264 }
 0x11a   :  { %91 = vsyncpa [#allocation3], 1 }
 0x11b   :  { %92 = vsyncpa [#allocation5], 1 }

// kernel: bidaf_output_forward.4
= control target key start
LH: loop header
LB: loop body
LE: loop exit
PB: predicated region body
PF: predicated region fallthrough
CT: control target
= control target key end

     0   :  { %v642_v16 = vmov 0.0   ;;  %v644_v17 = vmov 0.0   ;;  %v646_v18 = vmov 0.0   ;;  %v648_v19 = vmov 0.0   ;;  %s650_s21 = smov 0   ;;  %s770_s0 = inlined_call_operand.vmem [shape: f32[8,2,256], index: 0, kind: input, shape index: {}]   ;;  %s771_s1 = inlined_call_operand.vmem [shape: f32[8,2,1], index: 1, kind: input, shape index: {}]   ;;  %s772_s2 = inlined_call_operand.vmem [shape: f32[64,256], index: 2, kind: input, shape index: {}]   ;;  %s773_s3 = inlined_call_operand.vmem [shape: f32[1,64], index: 3, kind: input, shape index: {}]   ;;  %s774_s4 = inlined_call_operand.vmem [shape: f32[8,2], index: 4, kind: output, shape index: {}]  }
   0x1   :  { %v565_v0 = vld [vmem:[%s772_s2] sm:$0xff]  ;;  %v570_v1 = vld [vmem:[%s772_s2 + $0x8] sm:$0xff]  ;;  %v575_v2 = vld [vmem:[%s772_s2 + $0x10] sm:$0xff] }
   0x2   :  { %v580_v3 = vld [vmem:[%s772_s2 + $0x18] sm:$0xff]  ;;  %v585_v4 = vld [vmem:[%s772_s2 + $0x20] sm:$0xff]  ;;  %v590_v5 = vld [vmem:[%s772_s2 + $0x28] sm:$0xff] }
   0x3   :  { %v595_v6 = vld [vmem:[%s772_s2 + $0x30] sm:$0xff]  ;;  %v600_v7 = vld [vmem:[%s772_s2 + $0x38] sm:$0xff]  ;;  %v605_v8 = vld [vmem:[%s772_s2 + $0x40] sm:$0xff] }
   0x4   :  { %v610_v9 = vld [vmem:[%s772_s2 + $0x48] sm:$0xff]  ;;  %v615_v10 = vld [vmem:[%s772_s2 + $0x50] sm:$0xff]  ;;  %v620_v11 = vld [vmem:[%s772_s2 + $0x58] sm:$0xff] }
   0x5   :  { %v625_v12 = vld [vmem:[%s772_s2 + $0x60] sm:$0xff]  ;;  %v630_v13 = vld [vmem:[%s772_s2 + $0x68] sm:$0xff]  ;;  %v635_v14 = vld [vmem:[%s772_s2 + $0x70] sm:$0xff] }
   0x6   :  { %v640_v15 = vld [vmem:[%s772_s2 + $0x78] sm:$0xff] }
   0x7 LB: > { %74 = vmatpush.msra.mxu0 %v635_v14  ;;  %94 = vmatpush.msra.mxu1 %v640_v15  ;;  %s532_s2 = smov 32   ;;  %vm60_vm0 = vcmask 261120   ;;  %vm62_vm1 = vcmask 523264   ;;  %s43_s22 = ssub.s32 7, %s530_s21  ;;  %vm248_vm10 = vcmask 254976   ;;  %s530_s21 = sphi %s650_s21, %s38_s21   ;;  %v526_v19 = vphi %v648_v19, %v165_v19   ;;  %v522_v18 = vphi %v646_v18, %v174_v18   ;;  %v518_v17 = vphi %v644_v17, %v236_v17   ;;  %v514_v16 = vphi %v642_v16, %v245_v16  }
   0x8   : > { %57 = vrot.lane.b32.xlu0 %v518_v17, %s532_s2  ;;  %s426_s23 = sshll.u32 %s43_s22, 2  ;;  %s425_s27 = sshll.u32 %s530_s21, 2 }
   0x9   : > { %75 = vmatpush.msra.mxu0 %v625_v12  ;;  %95 = vmatpush.msra.mxu1 %v630_v13  ;;  %s50_s26 = scalar_lea.vmem %s770_s0, %s426_s23  ;;  %s46_s30 = scalar_lea.vmem %s770_s0, %s425_s27 }
   0xa   : > { %v51_v22 = vld [vmem:[%s50_s26] sm:$0xf]  ;;  %s533_s5 = smov 64   ;;  %s534_s6 = smov 96  }
   0xb   : > { %76 = vmatpush.msra.mxu0 %v615_v10  ;;  %96 = vmatpush.msra.mxu1 %v620_v11  ;;  %v176_v23 = vrot.slane %v51_v22, 2  ;;  %v47_v24 = vld [vmem:[%s46_s30] sm:$0xf]  ;;  %s712_s7 = sshll.u32 %s43_s22, 1  ;;  %s417_s11 = sshll.u32 %s530_s21, 1 }
   0xc   : > { %s54_s10 = scalar_lea.vmem %s771_s1, %s712_s7  ;;  %s52_s14 = scalar_lea.vmem %s771_s1, %s417_s11 }
   0xd   : > { %77 = vmatpush.msra.mxu0 %v605_v8  ;;  %97 = vmatpush.msra.mxu1 %v610_v9  ;;  %s247_s15 = scalar_lea.vmem [#allocation2], %s417_s11  ;;  %s251_s16 = scalar_lea.vmem [#allocation3], %s712_s7 }
   0xe   : > { %s38_s21 = sadd.s32 1, %s530_s21  }
   0xf   : > { %78 = vmatpush.msra.mxu0 %v595_v6  ;;  %98 = vmatpush.msra.mxu1 %v600_v7  ;;  %p35_p0 = scmp.ge.s32.totalorder %s38_s21, 8  }
  0x10   :  { %s536_s19 = smov (%p35_p0), 96   ;;  %vm367_vm11 = vcmask (%p35_p0), 1041409   ;;  %vm369_vm12 = vcmask (%p35_p0), 1042434   ;;  %vm371_vm13 = vcmask (%p35_p0), 1043459   ;;  %vm373_vm14 = vcmask (%p35_p0), 1044484  }
  0x11   : > { %79 = vmatpush.msra.mxu0 %v585_v4  ;;  %99 = vmatpush.msra.mxu1 %v590_v5  ;;  %vm375_vm15 = vcmask (%p35_p0), 1045509  }
  0x13   : > { %80 = vmatpush.msra.mxu0 %v575_v2  ;;  %100 = vmatpush.msra.mxu1 %v580_v3 }
  0x15   : > { %81 = vmatpush.msra.mxu0 %v565_v0  ;;  %101 = vmatpush.msra.mxu1 %v570_v1 }
  0x7a   : > { %v58_v20 = vpop.permute.xlu0 %57 }
  0x7b   : > { %v61_v21 = vsel %vm60_vm0, %v526_v19, %v58_v20  ;;  %vm377_vm0 = vcmask (%p35_p0), 1046534  }
  0x7c   : > { %421 = vmatmul.msk.f32.vlgmr.msra.gmra.mxu0 %vm62_vm1, %v61_v21  ;;  %422 = vmatmul.msk.f32.vlgmr.msra.gmra.mxu1 %vm62_vm1, %v61_v21  ;;  %vm379_vm1 = vcmask (%p35_p0), 1047559  }
  0xf9   : > { %v83_v25 = vpop.f32.mrf.mxu0  ;;  %v103_v26 = vpop.f32.mrf.mxu1 }
  0xfa   : > { %v106_v27 = vadd.f32 %v83_v25, %v47_v24  ;;  %v178_v28 = vadd.f32 %v176_v23, %v103_v26 }
  0xfc   : > { %475 = vtanh.f32 %v106_v27  ;;  %v423_v31 = vmul.f32 -1.442695, %v106_v27  ;;  %v424_v32 = vmul.f32 -1.442695, %v178_v28  ;;  %v535_v27 = vmov 0  }
  0xfd   : > { %477 = vtanh.f32 %v178_v28  ;;  %473 = vset.pattern.permute.xlu1 %v535_v27  ;;  %v55_v28 = vld [vmem:[%s54_s10] sm:$0x3]  ;;  %472 = vset.pattern.permute.xlu2 %v535_v27 }
  0xfe   : > { %479 = vpow2.f32 %v423_v31  ;;  %474 = vset.pattern.permute.xlu0 %v535_v27 }
  0xff   : > { %481 = vpow2.f32 %v424_v32 }
 0x102   : > { %v476_v29 = vpop.eup %475 }
 0x103   : > { %v478_v30 = vpop.eup %477  ;;  %133 = vrot.lane.b32.xlu0 %v476_v29, %s533_s5  ;;  %v53_v29 = vld [vmem:[%s52_s14] sm:$0x3] }
 0x104   : > { %205 = vrot.lane.b32.xlu1 %v478_v30, %s533_s5  ;;  %v480_v33 = vpop.eup %479 }
 0x105   : > { %v482_v34 = vpop.eup %481  ;;  %v110_v35 = vadd.f32 1.0, %v480_v33 }
 0x106   : > { %v182_v36 = vadd.f32 1.0, %v482_v34 }
 0x107   : > { %483 = vrcp.f32 %v110_v35  ;;  %v122_v47 = vand.u32 2147483648, %v110_v35  ;;  %vm116_vm4 = vweird.f32 %v110_v35  ;;  %v120_v49 = vand.u32 2147483647, %v110_v35 }
 0x108   : > { %485 = vrcp.f32 %v182_v36  ;;  %v194_v48 = vand.u32 2147483648, %v182_v36  ;;  %vm188_vm5 = vweird.f32 %v182_v36  ;;  %v192_v50 = vand.u32 2147483647, %v182_v36 }
 0x109   : > { %v123_v53 = vor.u32 1.1754944e-38, %v122_v47  ;;  %vm121_vm8 = vcmp.eq.f32.partialorder %v120_v49, 8.507059e+37 }
 0x10a   : > { %v195_v54 = vor.u32 1.1754944e-38, %v194_v48  ;;  %vm193_vm9 = vcmp.eq.f32.partialorder %v192_v50, 8.507059e+37 }
 0x10c   : > { %128 = vrot.lane.b32.xlu1 %v522_v18, %s532_s2 }
 0x10d   : > { %v484_v37 = vpop.eup %483 }
 0x10e   : > { %v486_v38 = vpop.eup %485  ;;  %v112_v39 = vmul.f32 %v484_v37, %v110_v35  ;;  %vm117_vm2 = vweird.f32 %v484_v37 }
 0x10f   : > { %v184_v40 = vmul.f32 %v486_v38, %v182_v36  ;;  %vm189_vm3 = vweird.f32 %v486_v38  ;;  %vm118_vm6 = vmor %vm116_vm4, %vm117_vm2  ;;  %vm382_vm2 = vcmask (%p35_p0), 15360  }
 0x110   : > { %v113_v41 = vsub.f32 1.0, %v112_v39  ;;  %vm190_vm7 = vmor %vm188_vm5, %vm189_vm3 }
 0x111   : > { %v185_v42 = vsub.f32 1.0, %v184_v40 }
 0x112   : > { %v114_v43 = vmul.f32 %v484_v37, %v113_v41 }
 0x113   : > { %v186_v44 = vmul.f32 %v486_v38, %v185_v42 }
 0x114   : > { %v115_v45 = vadd.f32 %v484_v37, %v114_v43 }
 0x115   : > { %v187_v46 = vadd.f32 %v486_v38, %v186_v44 }
 0x116   : > { %v119_v51 = vsel %vm118_vm6, %v484_v37, %v115_v45 }
 0x117   : > { %v191_v52 = vsel %vm190_vm7, %v486_v38, %v187_v46  ;;  %v124_v56 = vsel %vm121_vm8, %v123_v53, %v119_v51 }
 0x118   : > { %v196_v58 = vsel %vm193_vm9, %v195_v54, %v191_v52 }
 0x175   : > { %v134_v55 = vpop.permute.xlu0 %133 }
 0x176   : > { %v206_v57 = vpop.permute.xlu1 %205  ;;  %v136_v59 = vmul.f32 %v134_v55, %v124_v56 }
 0x177   : > { %v208_v60 = vmul.f32 %v206_v57, %v196_v58 }
 0x178   : > { %138 = vrot.lane.b32.xlu2 %v136_v59, %s532_s2 }
 0x179   : > { %210 = vrot.lane.b32.xlu0 %v208_v60, %s532_s2 }
 0x17e   : > { %v129_v61 = vpop.permute.xlu1 %128 }
 0x17f   : > { %v131_v62 = vmul.f32 %v129_v61, %v124_v56 }
 0x180   : > { %200 = vrot.lane.b32.xlu2 %v514_v16, %s532_s2 }
 0x188   : > { %149 = vrot.lane.b32.xlu2 %v526_v19, %s534_s6 }
 0x190   : > { %155 = vperm.xlu2 %472, %v53_v29  }
 0x1d2   : > { %v139_v63 = vpop.permute.xlu2 %138 }
 0x1d3   : > { %v141_v20 = vadd.f32 %v139_v63, %v131_v62 }
 0x1d5   : > { %487 = vtanh.f32 %v141_v20  ;;  %v166_v34 = vsub.f32 %v141_v20, %v129_v61 }
 0x1da   : > { %v201_v22 = vpop.permute.xlu2 %200 }
 0x1db   : > { %v488_v21 = vpop.eup %487  ;;  %v203_v23 = vmul.f32 %v201_v22, %v196_v58 }
 0x1dc   : > { %144 = vrot.lane.b32.xlu1 %v488_v21, %s533_s5 }
 0x1e2   : > { %v150_v31 = vpop.permute.xlu2 %149 }
 0x1e4   : > { %220 = vrot.lane.b32.xlu1 %v518_v17, %s534_s6 }
 0x1ea   : > { %v156_v44 = vpop.permute.xlu2 %155 }
 0x1eb   : > { %v211_v24 = vpop.permute.xlu0 %210 }
 0x1ec   : > { %v213_v25 = vadd.f32 %v211_v24, %v203_v23  ;;  %226 = vperm.xlu1 %473, %v55_v28  }
 0x1ee   : > { %489 = vtanh.f32 %v213_v25  ;;  %v237_v41 = vsub.f32 %v213_v25, %v201_v22 }
 0x1f4   : > { %v490_v26 = vpop.eup %489 }
 0x1f5   : > { %216 = vrot.lane.b32.xlu0 %v490_v26, %s533_s5 }
 0x24e   : > { %v145_v30 = vpop.permute.xlu1 %144 }
 0x24f   : > { %v147_v32 = vmul.f32 %v145_v30, %v124_v56  ;;  %v491_v56 = vld [vmem:[%s773_s3] ss:$0 sm:$0xff] (%p35_p0) }
 0x251   : > { %v152_v33 = vsub.f32 %v147_v32, %v150_v31 }
 0x253   : > { %159 = vst [vmem:[#allocation1] ss:$4 sm:$0xff] %v152_v33 }
 0x256   : > { %v221_v38 = vpop.permute.xlu1 %220 }
 0x25a   : > { %v160_v35 = vld.sshfl [vmem:[#allocation1] sm:$0xff pattern:$0x73625140] }
 0x25b   : > { %168 = vst [vmem:[#allocation1] ss:$4 sm:$0xff] %v166_v34  ;;  %161 = vrot.lane.b32.xlu0 %v160_v35, %s532_s2 }
 0x25e   : > { %v227_v45 = vpop.permute.xlu1 %226 }
 0x262   : > { %v169_v36 = vld.sshfl [vmem:[#allocation1] sm:$0xff pattern:$0x73625140] }
 0x263   : > { %170 = vrot.lane.b32.xlu0 %v169_v36, %s534_s6 }
 0x267   : > { %v217_v37 = vpop.permute.xlu0 %216 }
 0x268   : > { %v219_v39 = vmul.f32 %v217_v37, %v196_v58 }
 0x26a   : > { %v223_v40 = vsub.f32 %v219_v39, %v221_v38 }
 0x26b   :  { %306 = vrot.lane.b32.xlu0 (%p35_p0), %v491_v56, %s536_s19 }
 0x26c   : > { %230 = vst [vmem:[#allocation1] ss:$4 sm:$0xff] %v223_v40 }
 0x273   : > { %v231_v42 = vld.sshfl [vmem:[#allocation1] sm:$0xff pattern:$0x73625140] }
 0x274   : > { %232 = vrot.lane.b32.xlu2 %v231_v42, %s532_s2  ;;  %239 = vst [vmem:[#allocation1] ss:$4 sm:$0xff] %v237_v41 }
 0x27b   : > { %v240_v43 = vld.sshfl [vmem:[#allocation1] sm:$0xff pattern:$0x73625140] }
 0x27c   : > { %241 = vrot.lane.b32.xlu1 %v240_v43, %s534_s6 }
 0x2cd   : > { %v162_v46 = vpop.permute.xlu0 %161 }
 0x2ce   : > { %v164_v47 = vmul.f32 %v162_v46, %v156_v44  ;;  %v233_v48 = vpop.permute.xlu2 %232 }
 0x2cf   : > { %v235_v49 = vmul.f32 %v233_v48, %v227_v45 }
 0x2d0   : > { %v165_v19 = vadd.f32 %v526_v19, %v164_v47  }
 0x2d1   : > { %v236_v17 = vadd.f32 %v518_v17, %v235_v49  }
 0x2d2   : > { %v246_v50 = vmul.f32 %v165_v19, %v156_v44 }
 0x2d3   : > { %v250_v51 = vmul.f32 %v236_v17, %v227_v45 }
 0x2d4   : > { %249 = vst.msk [vmem:[%s247_s15] sm:$0x3] %vm248_vm10, %v246_v50 }
 0x2d5   : > { %252 = vst.msk [vmem:[%s251_s16] sm:$0x3] %vm248_vm10, %v250_v51  ;;  %v171_v52 = vpop.permute.xlu0 %170 }
 0x2d6   : > { %v173_v53 = vmul.f32 %v171_v52, %v156_v44 }
 0x2d8   : > { %v174_v18 = vadd.f32 %v522_v18, %v173_v53   ;;  %v357_v53 = vlaneseq (%p35_p0) }
 0x2db   :  { %v256_v57 = vld [vmem:[#allocation2 + $0x4] sm:$0x3] (%p35_p0)  ;;  %v257_v59 = vld [vmem:[#allocation2 + $0x6] sm:$0x3] (%p35_p0)  ;;  %v255_v61 = vld [vmem:[#allocation2 + $0x2] sm:$0x3] (%p35_p0) }
 0x2dc   :  { %v267_v58 = vmul.f32 (%p35_p0), %v491_v56, %v256_v57  ;;  %v268_v62 = vmul.f32 (%p35_p0), %v491_v56, %v257_v59  ;;  %v266_v63 = vmul.f32 (%p35_p0), %v491_v56, %v255_v61  ;;  %v258_v0 = vld [vmem:[#allocation2 + $0x8] sm:$0x3] (%p35_p0)  ;;  %v259_v3 = vld [vmem:[#allocation2 + $0xa] sm:$0x3] (%p35_p0)  ;;  %v260_v6 = vld [vmem:[#allocation2 + $0xc] sm:$0x3] (%p35_p0) }
 0x2dd   :  { %v269_v1 = vmul.f32 (%p35_p0), %v491_v56, %v258_v0  ;;  %v270_v4 = vmul.f32 (%p35_p0), %v491_v56, %v259_v3  ;;  %v271_v7 = vmul.f32 (%p35_p0), %v491_v56, %v260_v6  ;;  %v254_v9 = vld [vmem:[#allocation2] sm:$0x3] (%p35_p0)  ;;  %v299_v12 = vld [vmem:[#allocation3 + $0x2] sm:$0x3] (%p35_p0)  ;;  %v298_v13 = vld [vmem:[#allocation3] sm:$0x3] (%p35_p0)  ;;  %v307_v15 = vpop.permute.xlu0 (%p35_p0), %306 }
 0x2de   :  { %v280_v60 = vsel (%p35_p0), %vm248_vm10, %v267_v58, 0.0  ;;  %v277_v19 = vsel (%p35_p0), %vm248_vm10, %v266_v63, 0.0  ;;  %v283_v20 = vsel (%p35_p0), %vm248_vm10, %v268_v62, 0.0  ;;  %v265_v10 = vmul.f32 (%p35_p0), %v491_v56, %v254_v9  ;;  %v305_v14 = vld [vmem:[#allocation3 + $0xe] sm:$0x3] (%p35_p0) }
 0x2df   :  { %281 = vadd.xlane.f32.xlu2 (%p35_p0), %v280_v60  ;;  %278 = vadd.xlane.f32.xlu1 (%p35_p0), %v277_v19  ;;  %v286_v2 = vsel (%p35_p0), %vm248_vm10, %v269_v1, 0.0  ;;  %v289_v5 = vsel (%p35_p0), %vm248_vm10, %v270_v4, 0.0  ;;  %v292_v8 = vsel (%p35_p0), %vm248_vm10, %v271_v7, 0.0  ;;  %v309_v17 = vmul.f32 (%p35_p0), %v307_v15, %v298_v13  ;;  %v261_v21 = vld [vmem:[#allocation2 + $0xe] sm:$0x3] (%p35_p0) }
 0x2e0   :  { %v274_v11 = vsel (%p35_p0), %vm248_vm10, %v265_v10, 0.0  ;;  %v316_v18 = vmul.f32 (%p35_p0), %v307_v15, %v305_v14  ;;  %v300_v25 = vld [vmem:[#allocation3 + $0x4] sm:$0x3] (%p35_p0)  ;;  %v272_v26 = vmul.f32 (%p35_p0), %v491_v56, %v261_v21  ;;  %v301_v30 = vld [vmem:[#allocation3 + $0x6] sm:$0x3] (%p35_p0) }
 0x2e1   :  { %275 = vadd.xlane.f32.xlu0 (%p35_p0), %v274_v11  ;;  %v317_v23 = vsel (%p35_p0), %vm248_vm10, %v309_v17, 0.0  ;;  %v311_v27 = vmul.f32 (%p35_p0), %v307_v15, %v300_v25  ;;  %v312_v31 = vmul.f32 (%p35_p0), %v307_v15, %v301_v30  ;;  %v302_v33 = vld [vmem:[#allocation3 + $0x8] sm:$0x3] (%p35_p0)  ;;  %v303_v36 = vld [vmem:[#allocation3 + $0xa] sm:$0x3] (%p35_p0) }
 0x2e2   :  { %v338_v24 = vsel (%p35_p0), %vm248_vm10, %v316_v18, 0.0  ;;  %v295_v28 = vsel (%p35_p0), %vm248_vm10, %v272_v26, 0.0  ;;  %v313_v34 = vmul.f32 (%p35_p0), %v307_v15, %v302_v33  ;;  %v314_v37 = vmul.f32 (%p35_p0), %v307_v15, %v303_v36  ;;  %v304_v39 = vld [vmem:[#allocation3 + $0xc] sm:$0x3] (%p35_p0) }
 0x2e3   :  { %v323_v29 = vsel (%p35_p0), %vm248_vm10, %v311_v27, 0.0  ;;  %v326_v32 = vsel (%p35_p0), %vm248_vm10, %v312_v31, 0.0  ;;  %v315_v40 = vmul.f32 (%p35_p0), %v307_v15, %v304_v39 }
 0x2e4   :  { %v329_v35 = vsel (%p35_p0), %vm248_vm10, %v313_v34, 0.0  ;;  %v332_v38 = vsel (%p35_p0), %vm248_vm10, %v314_v37, 0.0 }
 0x2e5   :  { %v335_v41 = vsel (%p35_p0), %vm248_vm10, %v315_v40, 0.0 }
 0x2e7   :  { %284 = vadd.xlane.f32.xlu2 (%p35_p0), %v283_v20  ;;  %318 = vadd.xlane.f32.xlu1 (%p35_p0), %v317_v23 }
 0x2e9   :  { %339 = vadd.xlane.f32.xlu0 (%p35_p0), %v338_v24 }
 0x2ed   :  { %37 = sbr.rel (!%p35_p0) target bundleno = 7 (0x7), region = 49 }
 0x2ee   : > { %v242_v54 = vpop.permute.xlu1 %241 }
 0x2ef   : > { %v244_v55 = vmul.f32 %v242_v54, %v227_v45  ;;  %287 = vadd.xlane.f32.xlu2 (%p35_p0), %v286_v2  ;;  %324 = vadd.xlane.f32.xlu1 (%p35_p0), %v323_v29 }
 0x2f1   : > { %v245_v16 = vadd.f32 %v514_v16, %v244_v55   ;;  %v358_v55 = vand.u32 (%p35_p0), 127, %v357_v53 }
 0x2f2   :  { %v310_v16 = vmul.f32 %v307_v15, %v299_v12 }
 0x2f4   :  { %v320_v22 = vsel %vm248_vm10, %v310_v16, 0.0 }
 0x2f7   :  { %290 = vadd.xlane.f32.xlu2 %v289_v5  ;;  %327 = vadd.xlane.f32.xlu1 %v326_v32 }
 0x2ff   :  { %293 = vadd.xlane.f32.xlu2 %v292_v8  ;;  %330 = vadd.xlane.f32.xlu1 %v329_v35 }
 0x307   :  { %321 = vadd.xlane.f32.xlu2 %v320_v22  ;;  %333 = vadd.xlane.f32.xlu1 %v332_v38 }
 0x30f   :  { %296 = vadd.xlane.f32.xlu2 %v295_v28  ;;  %336 = vadd.xlane.f32.xlu1 %v335_v41 }
 0x352   :  { %v282_v42 = vpop.xlane.xlu2 %281  ;;  %v279_v44 = vpop.xlane.xlu1 %278 }
 0x354   :  { %v276_v54 = vpop.xlane.xlu0 %275 }
 0x35a   :  { %v285_v43 = vpop.xlane.xlu2 %284  ;;  %v319_v46 = vpop.xlane.xlu1 %318 }
 0x35b   :  { %v341_v57 = vadd.f32 %v319_v46, %v276_v54 }
 0x35c   :  { %v340_v2 = vpop.xlane.xlu0 %339 }
 0x35d   :  { %v359_v63 = vperm.slane %v341_v57, %v358_v55 }
 0x362   :  { %v288_v45 = vpop.xlane.xlu2 %287  ;;  %v325_v48 = vpop.xlane.xlu1 %324 }
 0x363   :  { %v343_v59 = vadd.f32 %v325_v48, %v282_v42 }
 0x365   :  { %v361_v0 = vperm.slane %v343_v59, %v358_v55 }
 0x36a   :  { %v291_v47 = vpop.xlane.xlu2 %290  ;;  %v328_v49 = vpop.xlane.xlu1 %327 }
 0x36b   :  { %v344_v60 = vadd.f32 %v328_v49, %v285_v43 }
 0x36d   :  { %v362_v1 = vperm.slane %v344_v60, %v358_v55 }
 0x372   :  { %v294_v50 = vpop.xlane.xlu2 %293  ;;  %v331_v51 = vpop.xlane.xlu1 %330 }
 0x373   :  { %v345_v61 = vadd.f32 %v331_v51, %v288_v45 }
 0x375   :  { %v363_v3 = vperm.slane %v345_v61, %v358_v55 }
 0x37a   :  { %v322_v52 = vpop.xlane.xlu2 %321  ;;  %v334_v58 = vpop.xlane.xlu1 %333 }
 0x37b   :  { %v342_v56 = vadd.f32 %v322_v52, %v279_v44  ;;  %v346_v19 = vadd.f32 %v334_v58, %v291_v47 }
 0x37d   :  { %v360_v62 = vperm.slane %v342_v56, %v358_v55  ;;  %v364_v6 = vperm.slane %v346_v19, %v358_v55 }
 0x37f   :  { %v368_v4 = vsel %vm367_vm11, %v360_v62, %v359_v63 }
 0x380   :  { %v370_v8 = vsel %vm369_vm12, %v361_v0, %v368_v4 }
 0x381   :  { %v372_v10 = vsel %vm371_vm13, %v362_v1, %v370_v8 }
 0x382   :  { %v297_v20 = vpop.xlane.xlu2 %296  ;;  %v337_v7 = vpop.xlane.xlu1 %336  ;;  %v374_v11 = vsel %vm373_vm14, %v363_v3, %v372_v10 }
 0x383   :  { %v348_v5 = vadd.f32 %v340_v2, %v297_v20  ;;  %v347_v9 = vadd.f32 %v337_v7, %v294_v50  ;;  %v376_v14 = vsel %vm375_vm15, %v364_v6, %v374_v11 }
 0x385   :  { %v365_v12 = vperm.slane %v347_v9, %v358_v55  ;;  %v366_v13 = vperm.slane %v348_v5, %v358_v55 }
 0x387   :  { %v378_v15 = vsel %vm377_vm0, %v365_v12, %v376_v14 }
 0x388   :  { %v380_v16 = vsel %vm379_vm1, %v366_v13, %v378_v15 }
 0x389   :  { %383 = vst.msk [vmem:[%s774_s4] sm:$0xff] %vm382_vm2, %v380_v16 }

</bundles_post_ra>
